<compile_context>
chip_gen: v7x
topology: tpu7x:2x2x1
jax: 0.10.0
libtpu: 0.0.40
codegen_flags: <defaults>
</compile_context>

<pallas_src>
import math

import jax
import jax.numpy as jnp
from jax import lax
from jax.experimental import pallas as pl
from jax.experimental.pallas import tpu as pltpu


def _attention_c_kernel(af_ref, dh_ref, mask_ref,
                        wf_ref, bf_ref, wd_ref, bd_ref,
                        wfull_ref, bfull_ref, out_ref):
    # af_ref   : (bt*N, F)  flattened feature rows of this batch tile
    # dh_ref   : (bt, D)
    # mask_ref : (1, bt*N)  lane-dense flattened attention mask
    # out_ref  : (bt, F)
    btn = af_ref.shape[0]
    bt = dh_ref.shape[0]
    n = btn // bt                      # static (trace-time) ints

    af = af_ref[...].astype(jnp.float32)           # cast in VMEM (HBM stays input dtype)
    wf = wf_ref[...]                                # (F, A)
    wd = wd_ref[...]                                # (D, A)

    # --- batched projections: one big MXU matmul for the whole tile ---------
    att1 = jnp.dot(af, wf, preferred_element_type=jnp.float32) + bf_ref[...]      # (bt*N, A)
    att2 = jnp.dot(dh_ref[...].astype(jnp.float32), wd,
                   preferred_element_type=jnp.float32) + bd_ref[...]              # (bt, A)

    # Expand att2 so feature row j gets the att2 row of its batch element
    # (j // n) via a tiny 0/1 matmul — avoids sublane relayout / gathers.
    j = lax.broadcasted_iota(jnp.int32, (btn, bt), 0)
    i = lax.broadcasted_iota(jnp.int32, (btn, bt), 1)
    expand = jnp.where((j >= i * n) & (j < (i + 1) * n), 1.0, 0.0)                 # (bt*N, bt)
    att2_rows = jnp.dot(expand, att2, preferred_element_type=jnp.float32)          # (bt*N, A)

    t = jnp.tanh(att1 + att2_rows)                                                 # (bt*N, A)

    # --- full_att as one NT dot: lane-dense logits for the whole tile -------
    logits = lax.dot_general(wfull_ref[...], t, (((1,), (1,)), ((), ())),
                             preferred_element_type=jnp.float32)                   # (1, bt*N)
    logits = logits + bfull_ref[0, 0]
    logits = logits + (1.0 - mask_ref[...]) * -10000.0                             # (1, bt*N)

    # --- block-diagonal softmax over the lane axis ---------------------------
    # Row b of the (bt, bt*N) logit matrix only keeps columns [b*n, (b+1)*n);
    # the rest are forced to ~-inf, so one batched softmax + one matmul
    # reproduces the per-batch-element softmax / weighted sum exactly
    # (out-of-block probabilities are exactly 0).
    r = lax.broadcasted_iota(jnp.int32, (bt, btn), 0)
    c = lax.broadcasted_iota(jnp.int32, (bt, btn), 1)
    in_block = (c >= r * n) & (c < (r + 1) * n)
    l = jnp.where(in_block, logits, -1e30)                                         # (bt, bt*N)
    l = l - jnp.max(l, axis=-1, keepdims=True)
    p = jnp.exp(l)
    denom = jnp.sum(p, axis=-1, keepdims=True)                                     # (bt, 1)
    alpha = p * (1.0 / denom)                                                      # (bt, bt*N)

    # --- context: one dense matmul, one dense (bt, F) store ------------------
    ctx = jnp.dot(alpha, af, preferred_element_type=jnp.float32)                   # (bt, F)
    out_ref[...] = ctx.astype(out_ref.dtype)


def _pick_batch_tile(b, block_b):
    """Batch tile that divides B (no pad copy of the dominant HBM stream) and
    keeps every BlockSpec sublane-aligned (tile % 8 == 0, unless it covers the
    whole batch).  For v7x prefer B // bt >= 2 so both TensorCores get work."""
    if b <= block_b:
        return b
    for d in range(block_b, 0, -1):
        if b % d == 0 and d % 8 == 0:
            return d
    return b   # no aligned divisor: whole batch in one grid step


def _resident_spec(shape):
    """Constant-index weight/bias block: fetched once, single-buffered."""
    return pl.BlockSpec(shape, lambda g: (0,) * len(shape),
                        pipeline_mode=pl.Buffered(1))


def attention_c(attended_features, decoder_hidden, params,
                attention_mask=None, block_b=8):
    """Pallas implementation of AttentionC.forward -> context (B, F)."""
    wf, bf = params["wf"], params["bf"]              # (A, F), (A,)
    wd, bd = params["wd"], params["bd"]              # (A, D), (A,)
    wfull, bfull = params["wfull"], params["bfull"]  # (1, A), (1,)

    B, N, F = attended_features.shape
    D = decoder_hidden.shape[-1]
    A = wf.shape[0]

    if attention_mask is None:
        attention_mask = jnp.ones((B, N), dtype=jnp.float32)

    bt = _pick_batch_tile(B, block_b)
    bg = B // bt

    # Contiguous (copy-free) reshapes only; the big feature stream keeps its
    # input dtype (bf16 inputs stay bf16 in HBM — the kernel is HBM-bound).
    af_flat = attended_features.reshape(B * N, F)
    mask3 = attention_mask.astype(jnp.float32).reshape(bg, 1, bt * N)

    # Pre-transpose weights once so the kernel never transposes.
    wf_t = wf.T.astype(jnp.float32)                      # (F, A)
    wd_t = wd.T.astype(jnp.float32)                      # (D, A)
    bf_2d = bf.reshape(1, A).astype(jnp.float32)
    bd_2d = bd.reshape(1, A).astype(jnp.float32)
    wfull_row = wfull.reshape(1, A).astype(jnp.float32)
    bfull_2d = bfull.reshape(1, 1).astype(jnp.float32)   # scalar, goes to SMEM

    out = pl.pallas_call(
        _attention_c_kernel,
        out_shape=jax.ShapeDtypeStruct((B, F), attended_features.dtype),
        grid_spec=pltpu.PrefetchScalarGridSpec(
            num_scalar_prefetch=0,
            grid=(bg,),
            in_specs=[
                pl.BlockSpec((bt * N, F), lambda g: (g, 0)),          # features (flat rows)
                pl.BlockSpec((bt, D), lambda g: (g, 0)),              # decoder hidden
                pl.BlockSpec((None, 1, bt * N), lambda g: (g, 0, 0)), # mask (lane-dense)
                _resident_spec((F, A)),                               # Wf^T
                _resident_spec((1, A)),                               # bf
                _resident_spec((D, A)),                               # Wd^T
                _resident_spec((1, A)),                               # bd
                _resident_spec((1, A)),                               # full_att weight row
                pl.BlockSpec(memory_space=pltpu.MemorySpace.SMEM),    # full_att bias scalar
            ],
            out_specs=pl.BlockSpec((bt, F), lambda g: (g, 0)),
        ),
        compiler_params=pltpu.CompilerParams(
            dimension_semantics=("parallel",)),
    )(af_flat, decoder_hidden, mask3,
      wf_t, bf_2d, wd_t, bd_2d, wfull_row, bfull_2d)
    return out


def attention_c_ref(attended_features, decoder_hidden, params,
                    attention_mask=None):
    """Pure-JAX reference matching the PyTorch forward."""
    att1 = attended_features @ params["wf"].T + params["bf"]       # (B, N, A)
    att2 = decoder_hidden @ params["wd"].T + params["bd"]          # (B, A)
    att = jnp.tanh(att1 + att2[:, None, :]) @ params["wfull"].T    # (B, N, 1)
    att = att[..., 0] + params["bfull"][0]                         # (B, N)
    if attention_mask is not None:
        att = att + (1.0 - attention_mask) * -10000.0
    alpha = jax.nn.softmax(att, axis=1)                            # (B, N)
    context = (attended_features * alpha[:, :, None]).sum(axis=1)  # (B, F)
    return context


def init_params(key, image_features_dim, decoder_dim, attention_dim):
    ks = jax.random.split(key, 6)
    bf_bound = 1.0 / math.sqrt(image_features_dim)
    bd_bound = 1.0 / math.sqrt(decoder_dim)
    ba_bound = 1.0 / math.sqrt(attention_dim)
    return {
        "wf": jax.random.uniform(ks[0], (attention_dim, image_features_dim),
                                 jnp.float32, -bf_bound, bf_bound),
        "bf": jax.random.uniform(ks[1], (attention_dim,),
                                 jnp.float32, -bf_bound, bf_bound),
        "wd": jax.random.uniform(ks[2], (attention_dim, decoder_dim),
                                 jnp.float32, -bd_bound, bd_bound),
        "bd": jax.random.uniform(ks[3], (attention_dim,),
                                 jnp.float32, -bd_bound, bd_bound),
        "wfull": jax.random.uniform(ks[4], (1, attention_dim),
                                    jnp.float32, -ba_bound, ba_bound),
        "bfull": jax.random.uniform(ks[5], (1,),
                                    jnp.float32, -ba_bound, ba_bound),
    }


if __name__ == "__main__":
    B, N = 2, 16                 # batch, number of attended image regions
    F, D, A = 32, 16, 32         # image_features_dim, decoder_dim, attention_dim

    key = jax.random.PRNGKey(0)
    kp, ka, kh, km = jax.random.split(key, 4)

    params = init_params(kp, F, D, A)
    attended_features = jax.random.normal(ka, (B, N, F), jnp.float32)
    decoder_hidden = jax.random.normal(kh, (B, D), jnp.float32)
    attention_mask = (jax.random.uniform(km, (B, N)) > 0.3).astype(jnp.float32)

    # Masked path.
    out = attention_c(attended_features, decoder_hidden, params, attention_mask)
    out = jax.block_until_ready(out)
    ref = attention_c_ref(attended_features, decoder_hidden, params,
                          attention_mask)
    assert out.shape == (B, F)
    assert jnp.allclose(out, ref, atol=1e-4, rtol=1e-4), "mismatch (masked)"

    # attention_mask=None path.
    out2 = attention_c(attended_features, decoder_hidden, params, None)
    out2 = jax.block_until_ready(out2)
    ref2 = attention_c_ref(attended_features, decoder_hidden, params, None)
    assert out2.shape == (B, F)
    assert jnp.allclose(out2, ref2, atol=1e-4, rtol=1e-4), "mismatch (no mask)"

    print("KERNEL_OK")
</pallas_src>

<mosaic_0001>
module attributes {stable_mosaic.version = 11 : i64} {
  func.func @_attention_c_kernel(%arg0: i32, %arg1: memref<32x32xf32, #tpu.memory_space<vmem>>, %arg2: memref<2x16xf32, #tpu.memory_space<vmem>>, %arg3: memref<1x1x32xf32, #tpu.memory_space<vmem>>, %arg4: memref<32x32xf32, #tpu.memory_space<vmem>>, %arg5: memref<1x32xf32, #tpu.memory_space<vmem>>, %arg6: memref<16x32xf32, #tpu.memory_space<vmem>>, %arg7: memref<1x32xf32, #tpu.memory_space<vmem>>, %arg8: memref<1x32xf32, #tpu.memory_space<vmem>>, %arg9: memref<1x1xf32, #tpu.memory_space<smem>>, %arg10: memref<2x32xf32, #tpu.memory_space<vmem>>) attributes {dimension_semantics = [#tpu.dimension_semantics<parallel>], iteration_bounds = array<i64: 1>, scalar_prefetch = 0 : i64, scratch_operands = 0 : i64, tpu.core_type = #tpu.core_type<tc>, window_params = [{transform_indices = @transform_0, window_bounds = array<i64: 32, 32>}, {transform_indices = @transform_1, window_bounds = array<i64: 2, 16>}, {transform_indices = @transform_2, window_bounds = array<i64: 1, 1, 32>}, {pipeline_mode = #tpu.pipeline_mode<synchronous>, transform_indices = @transform_3, window_bounds = array<i64: 32, 32>}, {pipeline_mode = #tpu.pipeline_mode<synchronous>, transform_indices = @transform_4, window_bounds = array<i64: 1, 32>}, {pipeline_mode = #tpu.pipeline_mode<synchronous>, transform_indices = @transform_5, window_bounds = array<i64: 16, 32>}, {pipeline_mode = #tpu.pipeline_mode<synchronous>, transform_indices = @transform_6, window_bounds = array<i64: 1, 32>}, {pipeline_mode = #tpu.pipeline_mode<synchronous>, transform_indices = @transform_7, window_bounds = array<i64: 1, 32>}, {transform_indices = @transform_8, window_bounds = array<i64: 1, 1>}, {transform_indices = @transform_9, window_bounds = array<i64: 2, 32>}]} {
    %c0 = arith.constant 0 : index
    %c0_0 = arith.constant 0 : index
    %0 = vector.load %arg1[%c0, %c0_0] : memref<32x32xf32, #tpu.memory_space<vmem>>, vector<32x32xf32>
    %c0_1 = arith.constant 0 : index
    %c0_2 = arith.constant 0 : index
    %1 = vector.load %arg4[%c0_1, %c0_2] : memref<32x32xf32, #tpu.memory_space<vmem>>, vector<32x32xf32>
    %c0_3 = arith.constant 0 : index
    %c0_4 = arith.constant 0 : index
    %2 = vector.load %arg6[%c0_3, %c0_4] : memref<16x32xf32, #tpu.memory_space<vmem>>, vector<16x32xf32>
    %cst = arith.constant dense<0.000000e+00> : vector<32x32xf32>
    %3 = tpu.matmul %0, %1, %cst {dimension_numbers = #tpu.dot_dimension_numbers<[1], [0], [0], [1], [0, 0, 1, 1], [], []>} : vector<32x32xf32>, vector<32x32xf32>, vector<32x32xf32> -> vector<32x32xf32>
    %c0_5 = arith.constant 0 : index
    %c0_6 = arith.constant 0 : index
    %4 = vector.load %arg5[%c0_5, %c0_6] : memref<1x32xf32, #tpu.memory_space<vmem>>, vector<1x32xf32>
    %5 = vector.broadcast %4 : vector<1x32xf32> to vector<32x32xf32>
    %6 = arith.addf %3, %5 : vector<32x32xf32>
    %c0_7 = arith.constant 0 : index
    %c0_8 = arith.constant 0 : index
    %7 = vector.load %arg2[%c0_7, %c0_8] : memref<2x16xf32, #tpu.memory_space<vmem>>, vector<2x16xf32>
    %cst_9 = arith.constant dense<0.000000e+00> : vector<2x32xf32>
    %8 = tpu.matmul %7, %2, %cst_9 {dimension_numbers = #tpu.dot_dimension_numbers<[1], [0], [0], [1], [0, 0, 1, 1], [], []>} : vector<2x16xf32>, vector<16x32xf32>, vector<2x32xf32> -> vector<2x32xf32>
    %c0_10 = arith.constant 0 : index
    %c0_11 = arith.constant 0 : index
    %9 = vector.load %arg7[%c0_10, %c0_11] : memref<1x32xf32, #tpu.memory_space<vmem>>, vector<1x32xf32>
    %10 = vector.broadcast %9 : vector<1x32xf32> to vector<2x32xf32>
    %11 = arith.addf %8, %10 : vector<2x32xf32>
    %12 = tpu.iota {dimensions = array<i32: 0>} : vector<32x2xi32>
    %13 = tpu.iota {dimensions = array<i32: 1>} : vector<32x2xi32>
    %c16_i32 = arith.constant 16 : i32
    %14 = vector.broadcast %c16_i32 : i32 to vector<32x2xi32>
    %15 = arith.muli %13, %14 : vector<32x2xi32>
    %16 = arith.cmpi sge, %12, %15 : vector<32x2xi32>
    %c1_i32 = arith.constant 1 : i32
    %17 = vector.broadcast %c1_i32 : i32 to vector<32x2xi32>
    %18 = arith.addi %13, %17 : vector<32x2xi32>
    %c16_i32_12 = arith.constant 16 : i32
    %19 = vector.broadcast %c16_i32_12 : i32 to vector<32x2xi32>
    %20 = arith.muli %18, %19 : vector<32x2xi32>
    %21 = arith.cmpi slt, %12, %20 : vector<32x2xi32>
    %22 = arith.andi %16, %21 : vector<32x2xi1>
    %cst_13 = arith.constant 1.000000e+00 : f32
    %cst_14 = arith.constant 0.000000e+00 : f32
    %23 = vector.broadcast %cst_13 : f32 to vector<32x2xf32>
    %24 = vector.broadcast %cst_14 : f32 to vector<32x2xf32>
    %25 = arith.select %22, %23, %24 : vector<32x2xi1>, vector<32x2xf32>
    %cst_15 = arith.constant dense<0.000000e+00> : vector<32x32xf32>
    %26 = tpu.matmul %25, %11, %cst_15 {dimension_numbers = #tpu.dot_dimension_numbers<[1], [0], [0], [1], [0, 0, 1, 1], [], []>} : vector<32x2xf32>, vector<2x32xf32>, vector<32x32xf32> -> vector<32x32xf32>
    %27 = arith.addf %6, %26 : vector<32x32xf32>
    %28 = math.tanh %27 : vector<32x32xf32>
    %c0_16 = arith.constant 0 : index
    %c0_17 = arith.constant 0 : index
    %29 = vector.load %arg8[%c0_16, %c0_17] : memref<1x32xf32, #tpu.memory_space<vmem>>, vector<1x32xf32>
    %cst_18 = arith.constant dense<0.000000e+00> : vector<1x32xf32>
    %30 = tpu.matmul %29, %28, %cst_18 {dimension_numbers = #tpu.dot_dimension_numbers<[1], [1], [0], [0], [0, 0, 1, 0], [], []>} : vector<1x32xf32>, vector<32x32xf32>, vector<1x32xf32> -> vector<1x32xf32>
    %c0_19 = arith.constant 0 : index
    %c0_20 = arith.constant 0 : index
    %31 = memref.load %arg9[%c0_19, %c0_20] : memref<1x1xf32, #tpu.memory_space<smem>>
    %32 = vector.broadcast %31 : f32 to vector<1x32xf32>
    %33 = arith.addf %30, %32 : vector<1x32xf32>
    %c0_21 = arith.constant 0 : index
    %c0_22 = arith.constant 0 : index
    %c0_23 = arith.constant 0 : index
    %34 = vector.load %arg3[%c0_21, %c0_22, %c0_23] : memref<1x1x32xf32, #tpu.memory_space<vmem>>, vector<1x1x32xf32>
    %35 = vector.shape_cast %34 : vector<1x1x32xf32> to vector<1x32xf32>
    %cst_24 = arith.constant 1.000000e+00 : f32
    %36 = vector.broadcast %cst_24 : f32 to vector<1x32xf32>
    %37 = arith.subf %36, %35 : vector<1x32xf32>
    %cst_25 = arith.constant -1.000000e+04 : f32
    %38 = vector.broadcast %cst_25 : f32 to vector<1x32xf32>
    %39 = arith.mulf %37, %38 : vector<1x32xf32>
    %40 = arith.addf %33, %39 : vector<1x32xf32>
    %41 = tpu.iota {dimensions = array<i32: 0>} : vector<2x32xi32>
    %42 = tpu.iota {dimensions = array<i32: 1>} : vector<2x32xi32>
    %c16_i32_26 = arith.constant 16 : i32
    %43 = vector.broadcast %c16_i32_26 : i32 to vector<2x32xi32>
    %44 = arith.muli %41, %43 : vector<2x32xi32>
    %45 = arith.cmpi sge, %42, %44 : vector<2x32xi32>
    %c1_i32_27 = arith.constant 1 : i32
    %46 = vector.broadcast %c1_i32_27 : i32 to vector<2x32xi32>
    %47 = arith.addi %41, %46 : vector<2x32xi32>
    %c16_i32_28 = arith.constant 16 : i32
    %48 = vector.broadcast %c16_i32_28 : i32 to vector<2x32xi32>
    %49 = arith.muli %47, %48 : vector<2x32xi32>
    %50 = arith.cmpi slt, %42, %49 : vector<2x32xi32>
    %51 = arith.andi %45, %50 : vector<2x32xi1>
    %cst_29 = arith.constant -1.000000e+30 : f32
    %52 = vector.shape_cast %40 : vector<1x32xf32> to vector<1x32xf32>
    %53 = vector.broadcast %52 : vector<1x32xf32> to vector<2x32xf32>
    %54 = vector.broadcast %cst_29 : f32 to vector<2x32xf32>
    %55 = arith.select %51, %53, %54 : vector<2x32xi1>, vector<2x32xf32>
    %cst_30 = arith.constant dense<0xFF800000> : vector<2xf32>
    %56 = vector.multi_reduction <maximumf>, %55, %cst_30 [1] : vector<2x32xf32> to vector<2xf32>
    %57 = vector.shape_cast %56 : vector<2xf32> to vector<2x1xf32>
    %58 = vector.broadcast %57 : vector<2x1xf32> to vector<2x32xf32>
    %59 = arith.subf %55, %58 : vector<2x32xf32>
    %60 = math.exp %59 : vector<2x32xf32>
    %cst_31 = arith.constant dense<0.000000e+00> : vector<2xf32>
    %61 = vector.multi_reduction <add>, %60, %cst_31 [1] : vector<2x32xf32> to vector<2xf32>
    %62 = vector.shape_cast %61 : vector<2xf32> to vector<2x1xf32>
    %cst_32 = arith.constant 1.000000e+00 : f32
    %63 = vector.broadcast %cst_32 : f32 to vector<2x1xf32>
    %64 = arith.divf %63, %62 : vector<2x1xf32>
    %65 = vector.broadcast %64 : vector<2x1xf32> to vector<2x32xf32>
    %66 = arith.mulf %60, %65 : vector<2x32xf32>
    %cst_33 = arith.constant dense<0.000000e+00> : vector<2x32xf32>
    %67 = tpu.matmul %66, %0, %cst_33 {dimension_numbers = #tpu.dot_dimension_numbers<[1], [0], [0], [1], [0, 0, 1, 1], [], []>} : vector<2x32xf32>, vector<32x32xf32>, vector<2x32xf32> -> vector<2x32xf32>
    %c0_34 = arith.constant 0 : index
    %c0_35 = arith.constant 0 : index
    %68 = vector.load %arg10[%c0_34, %c0_35] : memref<2x32xf32, #tpu.memory_space<vmem>>, vector<2x32xf32>
    tpu.vector_store %arg10[%c0_34, %c0_35], %67 {strides = array<i32>} : memref<2x32xf32, #tpu.memory_space<vmem>>, vector<2x32xf32>,
    return
  }
  func.func @transform_0(%arg0: i32) -> (i32, i32) {
    %c0_i32 = arith.constant 0 : i32
    %c0_i32_0 = arith.constant 0 : i32
    return %arg0, %c0_i32 : i32, i32
  }
  func.func @transform_1(%arg0: i32) -> (i32, i32) {
    %c0_i32 = arith.constant 0 : i32
    %c0_i32_0 = arith.constant 0 : i32
    return %arg0, %c0_i32 : i32, i32
  }
  func.func @transform_2(%arg0: i32) -> (i32, i32, i32) {
    %c0_i32 = arith.constant 0 : i32
    %c0_i32_0 = arith.constant 0 : i32
    %c0_i32_1 = arith.constant 0 : i32
    return %arg0, %c0_i32, %c0_i32_0 : i32, i32, i32
  }
  func.func @transform_3(%arg0: i32) -> (i32, i32) {
    %c0_i32 = arith.constant 0 : i32
    %c0_i32_0 = arith.constant 0 : i32
    %c0_i32_1 = arith.constant 0 : i32
    return %c0_i32, %c0_i32_0 : i32, i32
  }
  func.func @transform_4(%arg0: i32) -> (i32, i32) {
    %c0_i32 = arith.constant 0 : i32
    %c0_i32_0 = arith.constant 0 : i32
    %c0_i32_1 = arith.constant 0 : i32
    return %c0_i32, %c0_i32_0 : i32, i32
  }
  func.func @transform_5(%arg0: i32) -> (i32, i32) {
    %c0_i32 = arith.constant 0 : i32
    %c0_i32_0 = arith.constant 0 : i32
    %c0_i32_1 = arith.constant 0 : i32
    return %c0_i32, %c0_i32_0 : i32, i32
  }
  func.func @transform_6(%arg0: i32) -> (i32, i32) {
    %c0_i32 = arith.constant 0 : i32
    %c0_i32_0 = arith.constant 0 : i32
    %c0_i32_1 = arith.constant 0 : i32
    return %c0_i32, %c0_i32_0 : i32, i32
  }
  func.func @transform_7(%arg0: i32) -> (i32, i32) {
    %c0_i32 = arith.constant 0 : i32
    %c0_i32_0 = arith.constant 0 : i32
    %c0_i32_1 = arith.constant 0 : i32
    return %c0_i32, %c0_i32_0 : i32, i32
  }
  func.func @transform_8(%arg0: i32) -> (i32, i32) {
    %c0_i32 = arith.constant 0 : i32
    %c0_i32_0 = arith.constant 0 : i32
    %c0_i32_1 = arith.constant 0 : i32
    return %c0_i32, %c0_i32_0 : i32, i32
  }
  func.func @transform_9(%arg0: i32) -> (i32, i32) {
    %c0_i32 = arith.constant 0 : i32
    %c0_i32_0 = arith.constant 0 : i32
    return %arg0, %c0_i32 : i32, i32
  }
}

</mosaic_0001>

<bundles_post_ra>
// kernel: tpu_custom_call.1
= control target key start
LH: loop header
LB: loop body
LE: loop exit
PB: predicated region body
PF: predicated region fallthrough
CT: control target
= control target key end

     0   :  { %15 = vsyncpa [#allocation4], 0  ;;  %s985_s0 = inlined_call_operand.hbm [shape: f32[32,32], index: 0, kind: input, shape index: {}]   ;;  %s986_s1 = inlined_call_operand.vmem [shape: f32[2,16], index: 1, kind: input, shape index: {}]   ;;  %s987_s2 = inlined_call_operand.vmem [shape: f32[1,1,32], index: 2, kind: input, shape index: {}]   ;;  %s988_s3 = inlined_call_operand.hbm [shape: f32[32,32], index: 3, kind: input, shape index: {}]   ;;  %s989_s4 = inlined_call_operand.vmem [shape: f32[1,32], index: 4, kind: input, shape index: {}]   ;;  %s990_s5 = inlined_call_operand.vmem [shape: f32[16,32], index: 5, kind: input, shape index: {}]   ;;  %s991_s6 = inlined_call_operand.vmem [shape: f32[1,32], index: 6, kind: input, shape index: {}]   ;;  %s992_s7 = inlined_call_operand.vmem [shape: f32[1,32], index: 7, kind: input, shape index: {}]   ;;  %s993_s8 = inlined_call_operand.<no memory space> [shape: f32[1,1], index: 8, kind: input, shape index: {}]   ;;  %s994_s9 = inlined_call_operand.hbm [shape: f32[2,32], index: 9, kind: output, shape index: {}]  }
   0x1   :  { %16 = vsyncpa [#allocation7], 0 }
   0x2   :  { %17 = vsyncpa [#allocation5], 0  ;;  %s821_s30 = smov [#allocation3]   ;;  %s749_s13 = scalar_lea.hbm %s985_s0, 512 }
   0x3   :  { %s23_s10 = sshll.u32 %s821_s30, 4  ;;  %p750_p0 = scmp.ne.s32.totalorder %s985_s0, %s749_s13  ;;  %s24_s10 = int_to_ptr.vmem [resolvable:$true] %s23_s10 }
   0x4   :  { %p753_p1 = scmp.lt.u32.totalorder %s749_s13, %s985_s0 }
   0x6   :  { %p755_p2 = pnand %p753_p1, %p750_p0 }
   0x8   :  { %758 = shalt.err (!%p755_p2)
}
   0x9   :  { %s759_s18 = scalar_lea.vmem %s24_s10, 512  ;;  %p764_p4 = scmp.lt.s32.totalorder %s24_s10, %s24_s10 }
   0xa   :  { %p760_p3 = scmp.ne.s32.totalorder %s24_s10, %s759_s18  ;;  %p765_p5 = scmp.lt.s32.totalorder %s759_s18, %s759_s18 }
   0xc   :  { %p766_p6 = por %p765_p5, %p764_p4 }
   0xe   :  { %p767_p7 = pnand %p766_p6, %p760_p3 }
  0x10   :  { %770 = shalt.err (!%p767_p7)
}
  0x11   :  { %s822_s19 = smov 128   ;;  %s823_s20 = smov 8  }
  0x12   :  { %29 = dma.hbm_to_vmem [thread:$0]  %s985_s0, 512, %s24_s10, [#allocation4], %s822_s19, %s822_s19, %s823_s20  }
  0x13   :  { %s824_s23 = smov [#allocation6]   ;;  %s771_s27 = scalar_lea.hbm %s988_s3, 512 }
  0x14   :  { %s39_s24 = sshll.u32 %s824_s23, 4  ;;  %p772_p8 = scmp.ne.s32.totalorder %s988_s3, %s771_s27  ;;  %s40_s24 = int_to_ptr.vmem [resolvable:$true] %s39_s24 }
  0x15   :  { %p775_p9 = scmp.lt.u32.totalorder %s771_s27, %s988_s3 }
  0x17   :  { %p777_p10 = pnand %p775_p9, %p772_p8 }
  0x19   :  { %780 = shalt.err (!%p777_p10)
}
  0x1a   :  { %s781_s12 = scalar_lea.vmem %s40_s24, 512  ;;  %p786_p12 = scmp.lt.s32.totalorder %s40_s24, %s40_s24 }
  0x1b   :  { %p782_p11 = scmp.ne.s32.totalorder %s40_s24, %s781_s12  ;;  %p787_p13 = scmp.lt.s32.totalorder %s781_s12, %s781_s12 }
  0x1d   :  { %p788_p0 = por %p787_p13, %p786_p12 }
  0x1f   :  { %p789_p1 = pnand %p788_p0, %p782_p11 }
  0x21   :  { %792 = shalt.err (!%p789_p1)
}
  0x22   :  { %45 = dma.hbm_to_vmem [thread:$0]  %s988_s3, 512, %s40_s24, [#allocation7], %s822_s19, %s822_s19, %s823_s20  }
  0x23   :  { %815 = dma.done.wait [#allocation4], 512  }
  0x24   :  { %816 = vsyncadd [#allocation4], 4294966784 }
  0x25   :  { %817 = dma.done.wait [#allocation7], 512  }
  0x26   :  { %818 = vsyncadd [#allocation7], 4294966784  ;;  %v825_v0 = vmov 0.0|0.0   ;;  %vm826_vm0 = vmmov 0   ;;  %v827_v1 = vmov 0.0   ;;  %v70_v2 = vld [vmem:[%s990_s5] sm:$0xff]  ;;  %v259_v16 = vlaneseq }
  0x27   :  { %704 = vmatprep.subr.bf16.mxu1 %v825_v0  ;;  %663 = vmatprep.mubr.msk.f32.mxu1 %vm826_vm0, %v827_v1  ;;  %v71_v3 = vld [vmem:[%s990_s5 + $0x8] sm:$0xff]  ;;  %vm79_vm1 = vcmask 261120   ;;  %v66_v5 = vld [vmem:[#allocation6] sm:$0xff]  ;;  %v68_v7 = vld [vmem:[#allocation6 + $0x10] sm:$0xff]  ;;  %vm185_vm2 = vcmask 130048   ;;  %vm285_vm8 = vcmask 15360   ;;  %v397_v56 = vstv %s993_s8 }
  0x28   :  { %v705_v4 = vpack.c.bf16 %v71_v3, %v70_v2  ;;  %v67_v6 = vld [vmem:[#allocation6 + $0x8] sm:$0xff]  ;;  %v69_v9 = vld [vmem:[#allocation6 + $0x18] sm:$0xff]  ;;  %v62_v10 = vld [vmem:[#allocation3] sm:$0xff]  ;;  %v921_v17 = vand.u32 127, %v259_v16  ;;  %v924_v19 = vshrl.u32 %v259_v16, 7 }
  0x29   :  { %v696_v8 = vpack.c.bf16 %v67_v6, %v66_v5  ;;  %v63_v11 = vld [vmem:[#allocation3 + $0x8] sm:$0xff]  ;;  %v177_v12 = vld [vmem:[%s986_s1] sm:$0x3]  ;;  %v700_v13 = vpack.c.bf16 %v69_v9, %v68_v7  ;;  %653 = vmatprep.mubr.msk.f32.mxu0 %vm79_vm1, %v62_v10  ;;  %v64_v15 = vld [vmem:[#allocation3 + $0x10] sm:$0xff] }
  0x2a   :  { %706 = vmatpush3.bf16.msra.mxu1 %v705_v4  ;;  %v716_v14 = vpack.c.bf16 %v63_v11, %v62_v10  ;;  %v271_v18 = vadd.s32 1, %v921_v17  ;;  %v266_v20 = vmul.u32 16, %v921_v17  ;;  %v65_v22 = vld [vmem:[#allocation3 + $0x18] sm:$0xff]  ;;  %v261_v23 = vadd.s32 8, %v924_v19  ;;  %v606_v27 = vld [vmem:[%s991_s6] ss:$0 sm:$0xff] }
  0x2b   :  { %697 = vmatprep.subr.bf16.mxu0 %v696_v8  ;;  %707 = vmatprep.subr.bf16.mxu1 %v825_v0  ;;  %v262_v25 = vadd.s32 16, %v924_v19  ;;  %v263_v26 = vadd.s32 24, %v924_v19  ;;  %v719_v33 = vpack.c.bf16 %v65_v22, %v64_v15  ;;  %v601_v35 = vld [vmem:[%s989_s4] ss:$0 sm:$0xff]  ;;  %v489_v52 = vadd.s32 1, %v924_v19 }
  0x2c   :  { %699 = vmatpush3.bf16.msra.mxu0 %v696_v8  ;;  %v272_v21 = vmul.u32 16, %v271_v18  ;;  %vm267_vm3 = vcmp.ge.s32.totalorder %v924_v19, %v266_v20  ;;  %vm268_vm6 = vcmp.ge.s32.totalorder %v261_v23, %v266_v20  ;;  %v395_v50 = vld [vmem:[%s992_s7] sm:$0x1]  ;;  %v487_v54 = vmul.u32 16, %v924_v19 }
  0x2d   :  { %664 = vmatmul.mubr.msk.f32.vlgmr.msra.gmra.mrb[0].mxu1 %vm185_vm2, %v177_v12  ;;  %701 = vmatprep.subr.bf16.mxu0 %v700_v13  ;;  %vm269_vm10 = vcmp.ge.s32.totalorder %v262_v25, %v266_v20  ;;  %vm270_vm13 = vcmp.ge.s32.totalorder %v263_v26, %v266_v20  ;;  %vm298_vm2 = vcmask 1041408   ;;  %v483_v51 = vld [vmem:[%s987_s2] sm:$0x1]  ;;  %v490_v55 = vmul.u32 16, %v489_v52  ;;  %s828_s2 = smov [#allocation8]  }
  0x2e   :  { %682 = vmatprep.mubr.msk.f32.mxu1 %vm826_vm0, %v827_v1  ;;  %vm273_vm4 = vcmp.lt.s32.totalorder %v924_v19, %v272_v21  ;;  %vm274_vm7 = vcmp.lt.s32.totalorder %v261_v23, %v272_v21  ;;  %vm275_vm11 = vcmp.lt.s32.totalorder %v262_v25, %v272_v21  ;;  %vm276_vm14 = vcmp.lt.s32.totalorder %v263_v26, %v272_v21  ;;  %s591_s7 = sshll.u32 %s828_s2, 4  ;;  %s592_s7 = int_to_ptr.vmem [resolvable:$true] %s591_s7 }
  0x2f   :  { %vm277_vm5 = vmand %vm267_vm3, %vm273_vm4  ;;  %v484_v53 = vsub.f32 1.0, %v483_v51  ;;  %vm488_vm3 = vcmp.ge.s32.totalorder %v921_v17, %v487_v54  ;;  %vm491_vm4 = vcmp.lt.s32.totalorder %v921_v17, %v490_v55  ;;  %v495_v61 = vsub.s32 0, %v924_v19  ;;  %s793_s8 = scalar_lea.vmem %s592_s7, 32  ;;  %p798_p3 = scmp.lt.s32.totalorder %s592_s7, %s592_s7 }
  0x30   :  { %703 = vmatpush3.bf16.msra.mxu0 %v700_v13  ;;  %v281_v24 = vsel %vm277_vm5, 1.0, %v827_v1  ;;  %vm278_vm9 = vmand %vm268_vm6, %vm274_vm7  ;;  %vm498_vm6 = vcmask 254976   ;;  %p794_p2 = scmp.ne.s32.totalorder %s592_s7, %s793_s8  ;;  %p799_p4 = scmp.lt.s32.totalorder %s793_s8, %s793_s8 }
  0x31   :  { %vm279_vm12 = vmand %vm269_vm10, %vm275_vm11  ;;  %v282_v31 = vsel %vm278_vm9, 1.0, %v827_v1  ;;  %v485_v57 = vmul.f32 -10000.0, %v484_v53 }
  0x32   :  { %vm280_vm15 = vmand %vm270_vm13, %vm276_vm14  ;;  %v283_v32 = vsel %vm279_vm12, 1.0, %v827_v1  ;;  %p800_p5 = por %p799_p4, %p798_p3 }
  0x33   :  { %654 = vmatmul.mubr.msk.f32.vlgmr.msra.gmra.mrb[0].mxu0 %vm79_vm1, %v63_v11  ;;  %v284_v34 = vsel %vm280_vm15, 1.0, %v827_v1  ;;  %vm492_vm5 = vmand %vm488_vm3, %vm491_vm4 }
  0x34   :  { %656 = vmatprep.mubr.msk.f32.mxu0 %vm79_vm1, %v64_v15  ;;  %p801_p6 = pnand %p800_p5, %p794_p2 }
  0x37   :  { %657 = vmatmul.mubr.msk.f32.gmra.mrb[2].mxu0 %vm79_vm1, %v65_v22 }
  0x38   :  { %668 = vmatprep.mubr.msk.f32.mxu0 %vm285_vm8, %v281_v24 }
 0x100   :  { %v255_v28 = vpop.f32.mrb[0].mxu1 }
 0x101   :  { %v256_v29 = vadd.f32 %v606_v27, %v255_v28  ;;  %v665_v30 = vpop.f32.mrb[1].mxu1 }
 0x103   :  { %666 = vmatprep.subr.msk.mxu0 %vm298_vm2, %v256_v29 }
 0x104   :  { %667 = vmatpush3.msk.msra.mxu0 %vm298_vm2, %v256_v29 }
 0x105   :  { %669 = vmatmul.mubr.msk.f32.vlgmr.msra.gmra.mrb[0].mxu0 %vm285_vm8, %v282_v31  ;;  %715 = vmatprep.subr.bf16.mxu0 %v825_v0 }
 0x106   :  { %671 = vmatprep.mubr.msk.f32.mxu0 %vm285_vm8, %v283_v32  ;;  %717 = vmatpush3.bf16.msra.mxu0 %v716_v14 }
 0x107   :  { %718 = vmatprep.subr.bf16.mxu0 %v825_v0 }
 0x109   :  { %672 = vmatmul.mubr.msk.f32.gmra.mrb[2].mxu0 %vm285_vm8, %v284_v34 }
 0x10a   :  { %720 = vmatpush3.bf16.msra.mxu0 %v719_v33  ;;  %693 = vmatprep.mubr.msk.f32.mxu0 %vm826_vm0, %v827_v1  ;;  %vm709_vm0 = vmpackc.low %vm79_vm1, %vm79_vm1 }
 0x1d8   :  { %v670_v36 = vpop.f32.mrb[0].mxu0 }
 0x1d9   :  { %v721_v37 = vadd.f32 %v670_v36, %v601_v35  ;;  %v368_v38 = vpop.f32.mrb[1].mxu0 }
 0x1da   :  { %v722_v39 = vadd.f32 %v601_v35, %v368_v38 }
 0x1db   :  { %737 = vtanh.f32 %v721_v37 }
 0x1dc   :  { %739 = vtanh.f32 %v722_v39  ;;  %v673_v40 = vpop.f32.mrb[2].mxu0 }
 0x1dd   :  { %v723_v41 = vadd.f32 %v673_v40, %v601_v35  ;;  %v378_v42 = vpop.f32.mrb[3].mxu0 }
 0x1de   :  { %v724_v43 = vadd.f32 %v601_v35, %v378_v42 }
 0x1df   :  { %741 = vtanh.f32 %v723_v41 }
 0x1e0   :  { %743 = vtanh.f32 %v724_v43 }
 0x1e5   :  { %v738_v44 = vpop.eup %737 }
 0x1e6   :  { %v740_v45 = vpop.eup %739 }
 0x1e7   :  { %v708_v46 = vpack.c.bf16 %v738_v44, %v740_v45 }
 0x1e9   :  { %v742_v47 = vpop.eup %741  ;;  %710 = vmatpush3.bf16.xpose.msk.msra.mxu1 %vm709_vm0, %v708_v46 }
 0x1ea   :  { %v744_v48 = vpop.eup %743  ;;  %711 = vmatprep.subr.bf16.mxu1 %v825_v0 }
 0x1eb   :  { %v712_v49 = vpack.c.bf16 %v742_v47, %v744_v48 }
 0x1f1   :  { %714 = vmatpush3.bf16.xpose.msk.msra.mxu1 %vm709_vm0, %v712_v49 }
 0x1f8   :  { %683 = vmatmul.mubr.msk.f32.vlgmr.msra.gmra.mrb[2].mxu1 %vm79_vm1, %v395_v50 }
 0x2cb   :  { %v479_v58 = vpop.f32.mrb[2].mxu1 }
 0x2cc   :  { %v480_v59 = vadd.f32 %v479_v58, %v397_v56  ;;  %v684_v60 = vpop.f32.mrb[3].mxu1 }
 0x2ce   :  { %v486_v62 = vadd.f32 %v485_v57, %v480_v59 }
 0x2d0   :  { %v496_v63 = vrot.slane %v486_v62, %v495_v61 }
 0x2d2   :  { %v497_v0 = vsel %vm492_vm5, %v496_v63, -1e+30 }
 0x2d3   :  { %v499_v1 = vsel %vm498_vm6, %v497_v0, -inf }
 0x2d4   :  { %500 = vmax.xlane.f32.xlu0 %v499_v1 }
 0x361   :  { %v501_v2 = vpop.xlane.xlu0 %500 }
 0x362   :  { %v502_v3 = vsub.f32 %v497_v0, %v501_v2 }
 0x364   :  { %v503_v4 = vmul.f32 1.442695, %v502_v3 }
 0x366   :  { %745 = vpow2.f32 %v503_v4 }
 0x370   :  { %v746_v5 = vpop.eup %745 }
 0x371   :  { %v505_v6 = vsel %vm498_vm6, %v746_v5, 0.0 }
 0x372   :  { %506 = vadd.xlane.f32.xlu0 %v505_v6 }
 0x3ff   :  { %v507_v7 = vpop.xlane.xlu0 %506 }
 0x400   :  { %747 = vrcp.f32 %v507_v7 }
 0x40a   :  { %v748_v8 = vpop.eup %747 }
 0x40b   :  { %v510_v9 = vmul.f32 %v748_v8, %v746_v5 }
 0x40d   :  { %694 = vmatmul.mubr.msk.f32.vlgmr.msra.gmra.mrb[4].mxu0 %vm79_vm1, %v510_v9 }
 0x4e0   :  { %v580_v10 = vpop.f32.mrb[4].mxu0 }
 0x4e1   :  { %584 = vst.msk [vmem:[#allocation8] sm:$0x3] %vm498_vm6, %v580_v10  ;;  %v695_v11 = vpop.f32.mrb[5].mxu0 }
 0x4e2   :  { %804 = shalt.err (!%p801_p6)
}
 0x4e3   :  { %s805_s26 = scalar_lea.hbm %s994_s9, 32 }
 0x4e4   :  { %p806_p7 = scmp.ne.s32.totalorder %s994_s9, %s805_s26  ;;  %p809_p8 = scmp.lt.u32.totalorder %s805_s26, %s994_s9 }
 0x4e6   :  { %p811_p9 = pnand %p809_p8, %p806_p7 }
 0x4e8   :  { %814 = shalt.err (!%p811_p9)
}
 0x4e9   :  { %594 = dma.vmem_to_hbm [thread:$0]  %s592_s7, 32, %s994_s9, [#allocation5]  }
 0x4ea   :  { %819 = dma.done.wait [#allocation5], 32  }
 0x4eb   :  { %820 = vsyncadd [#allocation5], 4294967264 }
 0x4ec   :  { %598 = vsyncpa [#allocation4], 1 }
 0x4ed   :  { %599 = vsyncpa [#allocation7], 1 }
 0x4ee   :  { %600 = vsyncpa [#allocation5], 1 }

</bundles_post_ra>
